<compile_context>
chip_gen: v5e
topology: v5e:2x2
jax: 0.10.0
libtpu: 0.0.40
codegen_flags: <defaults>
</compile_context>

<pallas_src>
import functools
import math

import jax
import jax.numpy as jnp
from jax.experimental import pallas as pl
from jax.experimental.pallas import tpu as pltpu


def _se_kernel(x_ref, w1_ref, b1_ref, w2_ref, b2_ref, o_ref, *, inv_hw):
    # x_ref: (TB, C, HW) slab for TB batch elements, resident in VMEM.
    # Squeeze: global average pool over the spatial (lane) axis, accumulated in f32.
    pooled = jnp.sum(x_ref[...].astype(jnp.float32), axis=-1) * inv_hw        # (TB, C) f32
    # Excitation MLP: Linear -> ReLU -> Linear -> sigmoid (tiny; MXU/VPU/EUP).
    h = jnp.dot(pooled, w1_ref[...], preferred_element_type=jnp.float32) + b1_ref[...]
    h = jnp.maximum(h, 0.0)                                                    # (TB, C//r)
    z = jnp.dot(h, w2_ref[...], preferred_element_type=jnp.float32) + b2_ref[...]
    gate = jax.nn.sigmoid(z)                                                   # (TB, C)
    # Scale: re-read the slab (don't keep its vregs live across the MLP) and gate per channel.
    o_ref[...] = (x_ref[...] * gate[:, :, None]).astype(o_ref.dtype)


def _pick_tb(batch, per_image_bytes, budget_bytes):
    """Largest divisor of `batch` whose slab fits the VMEM budget; keep grid >= 2 if possible."""
    max_tb = max(1, budget_bytes // max(per_image_bytes, 1))
    best = 1
    for tb in range(1, batch + 1):
        if batch % tb != 0 or tb > max_tb:
            continue
        if batch == 1 or batch // tb >= 2:   # keep >=2 grid steps for v7x megacore
            best = tb
    return best


@jax.jit
def se_block(x_nchw, w1, b1, w2, b2):
    """SE block forward.  x_nchw: (B, C, H, W).  w1: (C, C//r), b1: (1, C//r),
    w2: (C//r, C), b2: (1, C).  Returns (B, C, H, W)."""
    B, C, H, W = x_nchw.shape
    HW = H * W
    Cr = w1.shape[1]
    itemsize = jnp.dtype(x_nchw.dtype).itemsize
    x3 = x_nchw.reshape(B, C, HW)        # free, contiguous reshape -> lane-dense layout

    # Per-step slab budget (~4 MiB): with double-buffered input + output this stays under
    # ~16 MiB, safe on v5e's 16 MiB scoped default and well inside v7x's 64 MiB physical VMEM.
    slab_budget = 4 * 1024 * 1024
    TB = _pick_tb(B, C * HW * itemsize, slab_budget)
    block_bytes = TB * C * HW * itemsize
    param_bytes = (w1.size + b1.size + w2.size + b2.size) * 4
    vmem_limit = min(max(4 * block_bytes + param_bytes + (2 << 20), 16 << 20), 48 << 20)

    kernel = functools.partial(_se_kernel, inv_hw=1.0 / float(HW))
    cost = pl.CostEstimate(
        flops=3 * B * C * HW + 4 * B * C * Cr,
        transcendentals=B * C,
        bytes_accessed=2 * B * C * HW * itemsize + param_bytes,
    )
    out = pl.pallas_call(
        kernel,
        out_shape=jax.ShapeDtypeStruct((B, C, HW), x_nchw.dtype),
        grid_spec=pltpu.PrefetchScalarGridSpec(
            num_scalar_prefetch=0,
            grid=(B // TB,),
            in_specs=[
                pl.BlockSpec((TB, C, HW), lambda b: (b, 0, 0)),  # activation slab
                pl.BlockSpec((C, Cr), lambda b: (0, 0)),         # w1 (resident across grid)
                pl.BlockSpec((1, Cr), lambda b: (0, 0)),         # b1
                pl.BlockSpec((Cr, C), lambda b: (0, 0)),         # w2
                pl.BlockSpec((1, C), lambda b: (0, 0)),          # b2
            ],
            out_specs=pl.BlockSpec((TB, C, HW), lambda b: (b, 0, 0)),
        ),
        compiler_params=pltpu.CompilerParams(
            dimension_semantics=("parallel",),
            vmem_limit_bytes=int(vmem_limit),
        ),
        cost_estimate=cost,
    )(x3, w1, b1, w2, b2)
    return out.reshape(B, C, H, W)


def se_block_ref(x, w1, b1, w2, b2):
    """Pure-JAX reference matching the PyTorch _SEBlock.forward semantics."""
    B, C, H, W = x.shape
    pooled = x.reshape(B, C, H * W).astype(jnp.float32).mean(-1)   # x.view(..., -1).mean(-1)
    h = jnp.maximum(pooled @ w1 + b1, 0.0)                         # relu(se_linear1(x))
    g = jax.nn.sigmoid(h @ w2 + b2)                                # sigmoid(se_linear2(x))
    return (x * g[:, :, None, None]).astype(x.dtype)               # torch.mul(input_x, gate)


if __name__ == "__main__":
    key = jax.random.PRNGKey(0)
    kx, k1, k2, k3, k4 = jax.random.split(key, 5)

    # Small shapes consistent with the module: in_ch=64, r=16 -> hidden 4.
    B, C, H, W, r = 2, 64, 16, 16, 16
    Cr = C // r

    x = jax.random.normal(kx, (B, C, H, W), jnp.float32)
    # nn.Linear-style params, stored pre-transposed as (in, out).
    bound1 = 1.0 / math.sqrt(C)
    w1 = jax.random.uniform(k1, (C, Cr), jnp.float32, -bound1, bound1)
    b1 = jax.random.uniform(k2, (1, Cr), jnp.float32, -bound1, bound1)
    bound2 = 1.0 / math.sqrt(Cr)
    w2 = jax.random.uniform(k3, (Cr, C), jnp.float32, -bound2, bound2)
    b2 = jax.random.uniform(k4, (1, C), jnp.float32, -bound2, bound2)

    out = se_block(x, w1, b1, w2, b2)
    out = jax.block_until_ready(out)

    assert out.shape == (B, C, H, W), out.shape
    assert bool(jnp.all(jnp.isfinite(out)))
    ref = se_block_ref(x, w1, b1, w2, b2)
    max_err = float(jnp.max(jnp.abs(out - ref)))
    assert max_err < 1e-4, max_err
    print("KERNEL_OK")
</pallas_src>

<mosaic_0001>
module attributes {stable_mosaic.version = 11 : i64} {
  func.func @_se_kernel(%arg0: i32, %arg1: memref<1x64x256xf32, #tpu.memory_space<vmem>>, %arg2: memref<64x4xf32, #tpu.memory_space<vmem>>, %arg3: memref<1x4xf32, #tpu.memory_space<vmem>>, %arg4: memref<4x64xf32, #tpu.memory_space<vmem>>, %arg5: memref<1x64xf32, #tpu.memory_space<vmem>>, %arg6: memref<1x64x256xf32, #tpu.memory_space<vmem>>) attributes {dimension_semantics = [#tpu.dimension_semantics<parallel>], iteration_bounds = array<i64: 2>, scalar_prefetch = 0 : i64, scratch_operands = 0 : i64, tpu.core_type = #tpu.core_type<tc>, window_params = [{transform_indices = @transform_0, window_bounds = array<i64: 1, 64, 256>}, {pipeline_mode = #tpu.pipeline_mode<synchronous>, transform_indices = @transform_1, window_bounds = array<i64: 64, 4>}, {pipeline_mode = #tpu.pipeline_mode<synchronous>, transform_indices = @transform_2, window_bounds = array<i64: 1, 4>}, {pipeline_mode = #tpu.pipeline_mode<synchronous>, transform_indices = @transform_3, window_bounds = array<i64: 4, 64>}, {pipeline_mode = #tpu.pipeline_mode<synchronous>, transform_indices = @transform_4, window_bounds = array<i64: 1, 64>}, {transform_indices = @transform_5, window_bounds = array<i64: 1, 64, 256>}]} {
    %c0 = arith.constant 0 : index
    %c0_0 = arith.constant 0 : index
    %c0_1 = arith.constant 0 : index
    %0 = vector.load %arg1[%c0, %c0_0, %c0_1] : memref<1x64x256xf32, #tpu.memory_space<vmem>>, vector<1x64x256xf32>
    %cst = arith.constant dense<0.000000e+00> : vector<1x64xf32>
    %1 = vector.multi_reduction <add>, %0, %cst [2] : vector<1x64x256xf32> to vector<1x64xf32>
    %cst_2 = arith.constant 3.906250e-03 : f32
    %2 = vector.broadcast %cst_2 : f32 to vector<1x64xf32>
    %3 = arith.mulf %1, %2 : vector<1x64xf32>
    %c0_3 = arith.constant 0 : index
    %c0_4 = arith.constant 0 : index
    %4 = vector.load %arg2[%c0_3, %c0_4] : memref<64x4xf32, #tpu.memory_space<vmem>>, vector<64x4xf32>
    %cst_5 = arith.constant dense<0.000000e+00> : vector<1x4xf32>
    %5 = tpu.matmul %3, %4, %cst_5 {dimension_numbers = #tpu.dot_dimension_numbers<[1], [0], [0], [1], [0, 0, 1, 1], [], []>} : vector<1x64xf32>, vector<64x4xf32>, vector<1x4xf32> -> vector<1x4xf32>
    %c0_6 = arith.constant 0 : index
    %c0_7 = arith.constant 0 : index
    %6 = vector.load %arg3[%c0_6, %c0_7] : memref<1x4xf32, #tpu.memory_space<vmem>>, vector<1x4xf32>
    %7 = arith.addf %5, %6 : vector<1x4xf32>
    %cst_8 = arith.constant 0.000000e+00 : f32
    %8 = vector.broadcast %cst_8 : f32 to vector<1x4xf32>
    %9 = arith.maximumf %7, %8 : vector<1x4xf32>
    %c0_9 = arith.constant 0 : index
    %c0_10 = arith.constant 0 : index
    %10 = vector.load %arg4[%c0_9, %c0_10] : memref<4x64xf32, #tpu.memory_space<vmem>>, vector<4x64xf32>
    %cst_11 = arith.constant dense<0.000000e+00> : vector<1x64xf32>
    %11 = tpu.matmul %9, %10, %cst_11 {dimension_numbers = #tpu.dot_dimension_numbers<[1], [0], [0], [1], [0, 0, 1, 1], [], []>} : vector<1x4xf32>, vector<4x64xf32>, vector<1x64xf32> -> vector<1x64xf32>
    %c0_12 = arith.constant 0 : index
    %c0_13 = arith.constant 0 : index
    %12 = vector.load %arg5[%c0_12, %c0_13] : memref<1x64xf32, #tpu.memory_space<vmem>>, vector<1x64xf32>
    %13 = arith.addf %11, %12 : vector<1x64xf32>
    %14 = arith.negf %13 : vector<1x64xf32>
    %15 = math.exp %14 : vector<1x64xf32>
    %cst_14 = arith.constant 1.000000e+00 : f32
    %16 = vector.broadcast %cst_14 : f32 to vector<1x64xf32>
    %17 = arith.addf %16, %15 : vector<1x64xf32>
    %18 = arith.divf %16, %17 : vector<1x64xf32>
    %c0_15 = arith.constant 0 : index
    %c0_16 = arith.constant 0 : index
    %c0_17 = arith.constant 0 : index
    %19 = vector.load %arg1[%c0_15, %c0_16, %c0_17] : memref<1x64x256xf32, #tpu.memory_space<vmem>>, vector<1x64x256xf32>
    %20 = vector.shape_cast %18 : vector<1x64xf32> to vector<1x64x1xf32>
    %21 = vector.broadcast %20 : vector<1x64x1xf32> to vector<1x64x256xf32>
    %22 = arith.mulf %19, %21 : vector<1x64x256xf32>
    %c0_18 = arith.constant 0 : index
    %c0_19 = arith.constant 0 : index
    %c0_20 = arith.constant 0 : index
    %23 = vector.load %arg6[%c0_18, %c0_19, %c0_20] : memref<1x64x256xf32, #tpu.memory_space<vmem>>, vector<1x64x256xf32>
    tpu.vector_store %arg6[%c0_18, %c0_19, %c0_20], %22 {strides = array<i32>} : memref<1x64x256xf32, #tpu.memory_space<vmem>>, vector<1x64x256xf32>,
    return
  }
  func.func @transform_0(%arg0: i32) -> (i32, i32, i32) {
    %c0_i32 = arith.constant 0 : i32
    %c0_i32_0 = arith.constant 0 : i32
    %c0_i32_1 = arith.constant 0 : i32
    return %arg0, %c0_i32, %c0_i32_0 : i32, i32, i32
  }
  func.func @transform_1(%arg0: i32) -> (i32, i32) {
    %c0_i32 = arith.constant 0 : i32
    %c0_i32_0 = arith.constant 0 : i32
    %c0_i32_1 = arith.constant 0 : i32
    return %c0_i32, %c0_i32_0 : i32, i32
  }
  func.func @transform_2(%arg0: i32) -> (i32, i32) {
    %c0_i32 = arith.constant 0 : i32
    %c0_i32_0 = arith.constant 0 : i32
    %c0_i32_1 = arith.constant 0 : i32
    return %c0_i32, %c0_i32_0 : i32, i32
  }
  func.func @transform_3(%arg0: i32) -> (i32, i32) {
    %c0_i32 = arith.constant 0 : i32
    %c0_i32_0 = arith.constant 0 : i32
    %c0_i32_1 = arith.constant 0 : i32
    return %c0_i32, %c0_i32_0 : i32, i32
  }
  func.func @transform_4(%arg0: i32) -> (i32, i32) {
    %c0_i32 = arith.constant 0 : i32
    %c0_i32_0 = arith.constant 0 : i32
    %c0_i32_1 = arith.constant 0 : i32
    return %c0_i32, %c0_i32_0 : i32, i32
  }
  func.func @transform_5(%arg0: i32) -> (i32, i32, i32) {
    %c0_i32 = arith.constant 0 : i32
    %c0_i32_0 = arith.constant 0 : i32
    %c0_i32_1 = arith.constant 0 : i32
    return %arg0, %c0_i32, %c0_i32_0 : i32, i32, i32
  }
}

</mosaic_0001>

<bundles_post_ra>
// kernel: se_block.1
= control target key start
LH: loop header
LB: loop body
LE: loop exit
PB: predicated region body
PF: predicated region fallthrough
CT: control target
= control target key end

     0   :  { %s606_s18 = smov 0   ;;  %s745_s0 = inlined_call_operand.vmem [shape: f32[2,64,256], index: 0, kind: input, shape index: {}]   ;;  %s746_s1 = inlined_call_operand.vmem [shape: f32[64,4], index: 1, kind: input, shape index: {}]   ;;  %s747_s2 = inlined_call_operand.vmem [shape: f32[1,4], index: 2, kind: input, shape index: {}]   ;;  %s748_s3 = inlined_call_operand.vmem [shape: f32[4,64], index: 3, kind: input, shape index: {}]   ;;  %s749_s4 = inlined_call_operand.vmem [shape: f32[1,64], index: 4, kind: input, shape index: {}]   ;;  %s750_s5 = inlined_call_operand.vmem [shape: f32[2,64,256], index: 5, kind: output, shape index: {}]  }
   0x1 LB: > { %s530_s19 = sadd.s32 4294967295, %s574_s18   ;;  %p534_p0 = scmp.ge.s32.totalorder %s574_s18, 1  ;;  %s574_s18 = sphi %s606_s18, %s15_s18  }
   0x2   : > { %p187_p1 = scmp.lt.s32.totalorder %s574_s18, 3 }
   0x4   : > { %p188_p2 = pnand %p534_p0, %p187_p1 }
   0x5   : > { %p215_p3 = scmp.lt.s32.totalorder (!%p188_p2), %s530_s19, 1 }
   0x6   : > { %191 = sbr.rel (%p188_p2) target bundleno = 594 (0x252), region = 40 }
   0xb   : > { %s752_s19 = smov (!%p215_p3, %s530_s19), 1  ;;  %v280_v24 = vld [vmem:[%s746_s1 + $0x38] sm:$0xff]  ;;  %v279_v25 = vld [vmem:[%s746_s1 + $0x30] sm:$0xff]  ;;  %v278_v26 = vld [vmem:[%s746_s1 + $0x28] sm:$0xff]  ;;  %v290_v32 = vlaneseq  ;;  %vm295_vm0 = vcmask 130112   ;;  %vm299_vm1 = vcmask 195712  }
   0xc   : > { %s545_s20 = sshll.u32 %s752_s19, 7  ;;  %332 = vmatpush.msra.mxu0 %v280_v24  ;;  %v277_v27 = vld [vmem:[%s746_s1 + $0x20] sm:$0xff]  ;;  %v276_v28 = vld [vmem:[%s746_s1 + $0x18] sm:$0xff]  ;;  %v275_v29 = vld [vmem:[%s746_s1 + $0x10] sm:$0xff]  ;;  %vm303_vm2 = vcmask 261312   ;;  %vm307_vm3 = vcmask 326912  }
   0xd   : > { %s219_s23 = scalar_lea.vmem %s745_s0, %s545_s20  ;;  %v274_v30 = vld [vmem:[%s746_s1 + $0x8] sm:$0xff]  ;;  %v273_v31 = vld [vmem:[%s746_s1] sm:$0xff]  ;;  %v291_v36 = vand.u32 127, %v290_v32  ;;  %vm311_vm4 = vcmask 392512   ;;  %vm315_vm5 = vcmask 458112   ;;  %vm319_vm6 = vcmask 523712   ;;  %s708_s26 = scalar_lea.vmem %s750_s5, %s545_s20 }
   0xe   : > { %v622_v0 = vld [vmem:[%s219_s23] sm:$0xff]  ;;  %v624_v1 = vld [vmem:[%s219_s23 + $0x8] sm:$0xff]  ;;  %v640_v9 = vld [vmem:[%s219_s23 + $0x10] sm:$0xff]  ;;  %333 = vmatpush.msra.mxu0 %v279_v25  ;;  %vm321_vm7 = vcmask 523264   ;;  %vm351_vm8 = vcmask 1043456   ;;  %vm347_vm9 = vcmask 31744  }
   0xf   : > { %v626_v2 = vld [vmem:[%s219_s23 + $0x20] sm:$0xff]  ;;  %v241_v3 = vadd.f32 %v624_v1, %v622_v0  ;;  %v630_v4 = vld [vmem:[%s219_s23 + $0x28] sm:$0xff]  ;;  %v642_v10 = vld [vmem:[%s219_s23 + $0x18] sm:$0xff]  ;;  %v293_v38 = vadd.s32 4294967288, %v291_v36  ;;  %v297_v39 = vadd.s32 4294967280, %v291_v36  ;;  %v301_v42 = vadd.s32 4294967272, %v291_v36 }
  0x10   : > { %v632_v5 = vld [vmem:[%s219_s23 + $0x40] sm:$0xff]  ;;  %v634_v6 = vld [vmem:[%s219_s23 + $0x48] sm:$0xff]  ;;  %v247_v7 = vadd.f32 %v630_v4, %v626_v2  ;;  %v644_v11 = vld [vmem:[%s219_s23 + $0x30] sm:$0xff]  ;;  %v244_v15 = vadd.f32 %v642_v10, %v640_v9  ;;  %334 = vmatpush.msra.mxu0 %v278_v26  ;;  %v305_v46 = vadd.s32 4294967264, %v291_v36  ;;  %v309_v53 = vadd.s32 4294967256, %v291_v36 }
  0x11   : > { %v253_v8 = vadd.f32 %v634_v6, %v632_v5  ;;  %242 = vadd.xlane.f32.xlu0 %v241_v3  ;;  %v646_v12 = vld [vmem:[%s219_s23 + $0x38] sm:$0xff]  ;;  %v648_v13 = vld [vmem:[%s219_s23 + $0x50] sm:$0xff]  ;;  %v658_v18 = vld [vmem:[%s219_s23 + $0x60] sm:$0xff]  ;;  %v313_v59 = vadd.s32 4294967248, %v291_v36  ;;  %v317_v62 = vadd.s32 4294967240, %v291_v36 }
  0x12   : > { %248 = vadd.xlane.f32.xlu1 %v247_v7  ;;  %v650_v14 = vld [vmem:[%s219_s23 + $0x58] sm:$0xff]  ;;  %v250_v16 = vadd.f32 %v646_v12, %v644_v11  ;;  %v660_v19 = vld [vmem:[%s219_s23 + $0x68] sm:$0xff]  ;;  %v662_v20 = vld [vmem:[%s219_s23 + $0x70] sm:$0xff]  ;;  %335 = vmatpush.msra.mxu0 %v277_v27 }
  0x13   : > { %254 = vadd.xlane.f32.xlu2 %v253_v8  ;;  %v256_v17 = vadd.f32 %v650_v14, %v648_v13  ;;  %v664_v21 = vld [vmem:[%s219_s23 + $0x78] sm:$0xff]  ;;  %v259_v22 = vadd.f32 %v660_v19, %v658_v18  ;;  %v345_v24 = vld [vmem:[%s748_s3] sm:$0xf] }
  0x14   : > { %v262_v23 = vadd.f32 %v664_v21, %v662_v20  ;;  %336 = vmatpush.msra.mxu0 %v276_v28  ;;  %540 = vmatpush.msk.msra.mxu1 %vm351_vm8, %v345_v24  ;;  %v281_v25 = vld [vmem:[%s747_s2] sm:$0x1] }
  0x16   : > { %337 = vmatpush.msra.mxu0 %v275_v29  ;;  %v396_v29 = vshrl.u32 %v290_v32, 7 }
  0x18   : > { %338 = vmatpush.msra.mxu0 %v274_v30  ;;  %555 = vset.pattern.permute.xlu2 %v396_v29  ;;  %v409_v30 = vadd.s32 16, %v396_v29 }
  0x19   : > { %245 = vadd.xlane.f32.xlu0 %v244_v15 }
  0x1a   : > { %251 = vadd.xlane.f32.xlu1 %v250_v16  ;;  %339 = vmatpush.msra.mxu0 %v273_v31  ;;  %v403_v31 = vadd.s32 8, %v396_v29 }
  0x1b   : > { %257 = vadd.xlane.f32.xlu2 %v256_v17  ;;  %557 = vset.pattern.permute.xlu1 %v409_v30 }
  0x1c   : > { %556 = vset.pattern.permute.xlu0 %v403_v31 }
  0x21   : > { %260 = vadd.xlane.f32.xlu0 %v259_v22 }
  0x22   : > { %263 = vadd.xlane.f32.xlu1 %v262_v23 }
  0x84   : > { %v243_v33 = vpop.xlane.xlu0 %242 }
  0x85   : > { %v249_v34 = vpop.xlane.xlu1 %248  ;;  %v265_v37 = vmul.f32 0.00390625, %v243_v33  ;;  %v346_v33 = vld [vmem:[%s749_s4] sm:$0x1] }
  0x86   : > { %v255_v35 = vpop.xlane.xlu2 %254  ;;  %v267_v40 = vmul.f32 0.00390625, %v249_v34 }
  0x87   : > { %v292_v48 = vperm.slane %v265_v37, %v291_v36  ;;  %v269_v49 = vmul.f32 0.00390625, %v255_v35 }
  0x88   : > { %v298_v51 = vperm.slane %v267_v40, %v297_v39 }
  0x89   : > { %v306_v57 = vperm.slane %v269_v49, %v305_v46  ;;  %v427_v49 = vadd.s32 40, %v396_v29 }
  0x8c   : > { %v246_v41 = vpop.xlane.xlu0 %245 }
  0x8d   : > { %v266_v43 = vmul.f32 0.00390625, %v246_v41  ;;  %v252_v44 = vpop.xlane.xlu1 %251 }
  0x8e   : > { %v258_v45 = vpop.xlane.xlu2 %257  ;;  %v268_v47 = vmul.f32 0.00390625, %v252_v44 }
  0x8f   : > { %v294_v50 = vperm.slane %v266_v43, %v293_v38  ;;  %v270_v54 = vmul.f32 0.00390625, %v258_v45 }
  0x90   : > { %v302_v52 = vperm.slane %v268_v47, %v301_v42 }
  0x91   : > { %v296_v55 = vsel %vm295_vm0, %v294_v50, %v292_v48  ;;  %v310_v60 = vperm.slane %v270_v54, %v309_v53  ;;  %v415_v50 = vadd.s32 24, %v396_v29  ;;  %v433_v53 = vadd.s32 48, %v396_v29 }
  0x92   : > { %v300_v56 = vsel %vm299_vm1, %v298_v51, %v296_v55  ;;  %v439_v51 = vadd.s32 56, %v396_v29 }
  0x93   : > { %v304_v58 = vsel %vm303_vm2, %v302_v52, %v300_v56  ;;  %v421_v52 = vadd.s32 32, %v396_v29 }
  0x94   : > { %v261_v61 = vpop.xlane.xlu0 %260  ;;  %v308_v7 = vsel %vm307_vm3, %v306_v57, %v304_v58 }
  0x95   : > { %v271_v63 = vmul.f32 0.00390625, %v261_v61  ;;  %v264_v3 = vpop.xlane.xlu1 %263  ;;  %v312_v17 = vsel %vm311_vm4, %v310_v60, %v308_v7 }
  0x96   : > { %v272_v8 = vmul.f32 0.00390625, %v264_v3 }
  0x97   : > { %v314_v15 = vperm.slane %v271_v63, %v313_v59 }
  0x98   : > { %v318_v16 = vperm.slane %v272_v8, %v317_v62 }
  0x99   : > { %v316_v22 = vsel %vm315_vm5, %v314_v15, %v312_v17 }
  0x9a   : > { %v320_v23 = vsel %vm319_vm6, %v318_v16, %v316_v22 }
  0x9b   : > { %539 = vmatmul.msk.f32.vlgmr.msra.gmra.mxu0 %vm321_vm7, %v320_v23 }
 0x118   : > { %v341_v26 = vpop.f32.mrf.mxu0 }
 0x119   : > { %v342_v27 = vadd.f32 %v341_v26, %v281_v25 }
 0x11b   : > { %v344_v28 = vmax.f32 %v342_v27, 0.0 }
 0x11d   : > { %541 = vmatmul.msk.f32.vlgmr.msra.gmra.mxu1 %vm347_vm9, %v344_v28 }
 0x19a   : > { %v372_v34 = vpop.f32.mrf.mxu1 }
 0x19b   : > { %v373_v35 = vadd.f32 %v372_v34, %v346_v33 }
 0x19d   : > { %v542_v36 = vmul.f32 -1.442695, %v373_v35 }
 0x19f   : > { %564 = vpow2.f32 %v542_v36 }
 0x1a5   : > { %v565_v37 = vpop.eup %564 }
 0x1a6   : > { %v378_v38 = vadd.f32 1.0, %v565_v37 }
 0x1a8   : > { %566 = vrcp.f32 %v378_v38  ;;  %v390_v32 = vand.u32 2147483648, %v378_v38  ;;  %v388_v43 = vand.u32 2147483647, %v378_v38  ;;  %vm384_vm11 = vweird.f32 %v378_v38 }
 0x1aa   : > { %v391_v45 = vor.u32 1.1754944e-38, %v390_v32  ;;  %vm389_vm13 = vcmp.eq.f32.partialorder %v388_v43, 8.507059e+37 }
 0x1ae   : > { %v567_v39 = vpop.eup %566 }
 0x1af   : > { %v380_v40 = vmul.f32 %v567_v39, %v378_v38  ;;  %vm385_vm10 = vweird.f32 %v567_v39 }
 0x1b0   : > { %vm386_vm12 = vmor %vm384_vm11, %vm385_vm10 }
 0x1b1   : > { %v381_v41 = vsub.f32 1.0, %v380_v40 }
 0x1b3   : > { %v382_v42 = vmul.f32 %v567_v39, %v381_v41 }
 0x1b5   : > { %v383_v44 = vadd.f32 %v567_v39, %v382_v42 }
 0x1b7   : > { %v387_v46 = vsel %vm386_vm12, %v567_v39, %v383_v44 }
 0x1b8   : > { %v392_v47 = vsel %vm389_vm13, %v391_v45, %v387_v46 }
 0x1b9   : > { %v394_v48 = vperm.slane %v392_v47, 0 }
 0x1bb   : > { %411 = vperm.xlu1 %557, %v394_v48   ;;  %405 = vperm.xlu0 %556, %v394_v48  }
 0x1bc   : > { %399 = vperm.xlu2 %555, %v394_v48  }
 0x1c3   : > { %560 = vset.pattern.permute.xlu1 %v427_v49  ;;  %563 = vset.pattern.permute.xlu0 %v439_v51 }
 0x1c4   : > { %558 = vset.pattern.permute.xlu2 %v415_v50 }
 0x1cb   : > { %429 = vperm.xlu1 %560, %v394_v48  }
 0x1cc   : > { %417 = vperm.xlu2 %558, %v394_v48  }
 0x1d3   : > { %562 = vset.pattern.permute.xlu1 %v439_v51 }
 0x1d4   : > { %559 = vset.pattern.permute.xlu2 %v421_v52 }
 0x1db   : > { %441 = vperm.xlu1 %562, %v394_v48  }
 0x1dc   : > { %423 = vperm.xlu2 %559, %v394_v48  }
 0x1e4   : > { %561 = vset.pattern.permute.xlu2 %v433_v53 }
 0x1ec   : > { %435 = vperm.xlu2 %561, %v394_v48  }
 0x216   : > { %v400_v54 = vpop.permute.xlu2 %399 }
 0x217   : > { %v443_v55 = vmul.f32 %v400_v54, %v622_v0  ;;  %v444_v56 = vmul.f32 %v400_v54, %v624_v1 }
 0x219   : > { %459 = vst [vmem:[%s708_s26] sm:$0xff] %v443_v55 }
 0x21a   : > { %460 = vst [vmem:[%s708_s26 + $0x8] sm:$0xff] %v444_v56 }
 0x226   : > { %v418_v57 = vpop.permute.xlu2 %417 }
 0x227   : > { %v449_v58 = vmul.f32 %v418_v57, %v644_v11  ;;  %v450_v59 = vmul.f32 %v418_v57, %v646_v12 }
 0x229   : > { %465 = vst [vmem:[%s708_s26 + $0x30] sm:$0xff] %v449_v58 }
 0x22a   : > { %466 = vst [vmem:[%s708_s26 + $0x38] sm:$0xff] %v450_v59 }
 0x22d   : > { %v412_v60 = vpop.permute.xlu1 %411  ;;  %v406_v61 = vpop.permute.xlu0 %405 }
 0x22e   : > { %v447_v0 = vmul.f32 %v412_v60, %v626_v2  ;;  %v448_v1 = vmul.f32 %v412_v60, %v630_v4  ;;  %v445_v62 = vmul.f32 %v406_v61, %v640_v9  ;;  %v446_v63 = vmul.f32 %v406_v61, %v642_v10 }
 0x230   : > { %463 = vst [vmem:[%s708_s26 + $0x20] sm:$0xff] %v447_v0 }
 0x231   : > { %464 = vst [vmem:[%s708_s26 + $0x28] sm:$0xff] %v448_v1 }
 0x232   : > { %461 = vst [vmem:[%s708_s26 + $0x10] sm:$0xff] %v445_v62 }
 0x233   : > { %462 = vst [vmem:[%s708_s26 + $0x18] sm:$0xff] %v446_v63 }
 0x236   : > { %v424_v11 = vpop.permute.xlu2 %423 }
 0x237   : > { %v451_v12 = vmul.f32 %v424_v11, %v632_v5  ;;  %v452_v3 = vmul.f32 %v424_v11, %v634_v6 }
 0x239   : > { %467 = vst [vmem:[%s708_s26 + $0x40] sm:$0xff] %v451_v12 }
 0x23a   : > { %468 = vst [vmem:[%s708_s26 + $0x48] sm:$0xff] %v452_v3 }
 0x23d   : > { %v430_v2 = vpop.permute.xlu1 %429 }
 0x23e   : > { %v453_v4 = vmul.f32 %v430_v2, %v648_v13  ;;  %v454_v9 = vmul.f32 %v430_v2, %v650_v14 }
 0x240   : > { %469 = vst [vmem:[%s708_s26 + $0x50] sm:$0xff] %v453_v4 }
 0x241   : > { %470 = vst [vmem:[%s708_s26 + $0x58] sm:$0xff] %v454_v9 }
 0x246   : > { %v436_v10 = vpop.permute.xlu2 %435 }
 0x247   : > { %v455_v7 = vmul.f32 %v436_v10, %v658_v18  ;;  %v456_v8 = vmul.f32 %v436_v10, %v660_v19 }
 0x249   : > { %471 = vst [vmem:[%s708_s26 + $0x60] sm:$0xff] %v455_v7 }
 0x24a   : > { %472 = vst [vmem:[%s708_s26 + $0x68] sm:$0xff] %v456_v8 }
 0x24d   : > { %v442_v5 = vpop.permute.xlu1 %441 }
 0x24e   : > { %v457_v6 = vmul.f32 %v442_v5, %v662_v20  ;;  %v458_v15 = vmul.f32 %v442_v5, %v664_v21 }
 0x250   : > { %473 = vst [vmem:[%s708_s26 + $0x70] sm:$0xff] %v457_v6 }
 0x251   : > { %474 = vst [vmem:[%s708_s26 + $0x78] sm:$0xff] %v458_v15 }
 0x252 PF: > { %s15_s18 = sadd.s32 1, %s574_s18  }
 0x253   : > { %p12_p4 = scmp.ge.s32.totalorder %s15_s18, 4  }
 0x255   :  { %14 = sbr.rel (!%p12_p4) target bundleno = 1 (0x1), region = 70 }

</bundles_post_ra>
